<compile_context>
chip_gen: v7x
topology: tpu7x:2x2x1
jax: 0.10.0
libtpu: 0.0.40
codegen_flags: <defaults>
</compile_context>

<pallas_src>
import jax
import jax.numpy as jnp
from jax.experimental import pallas as pl
from jax.experimental.pallas import tpu as pltpu


# ----------------------------------------------------------------------------
# Identity-copy kernel body (template for future children that transform x)
# ----------------------------------------------------------------------------
def _copy_kernel(x_ref, o_ref):
    o_ref[...] = x_ref[...]
    # TODO(synk): when ModuleWrapper gains children, fuse their per-element /
    # MXU work here and emit kl as a second (1, 1) output of this same kernel
    # (one launch total) instead of a separate pallas_call.


_SUBLANE_PACK = {4: 8, 2: 16, 1: 32}   # itemsize -> sublane packing
_MAX_LANES = 2048                      # cap on lane-dense slab width


def _is_v7x():
    try:
        kind = jax.devices()[0].device_kind.lower()
        return ("v7" in kind) or ("7x" in kind)
    except Exception:
        return False


def _pick_lanes(n):
    """Largest multiple of 128 that divides n, capped at _MAX_LANES.

    Caller guarantees n % 128 == 0, so this always terminates at >= 128.
    """
    lanes = min(_MAX_LANES, n)
    lanes -= lanes % 128
    while lanes > 128 and n % lanes != 0:
        lanes -= 128
    return lanes


def pallas_identity_copy(x):
    """Materializing identity via a pipelined, lane-dense tiled copy.

    Template only: module_wrapper_forward's default path is zero-copy and a
    pure materialized identity uses XLA's native copy.  This kernel is the
    insertion point for future children that actually compute on x.

    No wrapper-side pad or slice: the slab width divides x.size exactly
    (static shapes only -- fine under jit); ragged total sizes fall back to a
    single full-extent block.
    """
    orig_shape, dtype = x.shape, x.dtype
    n = x.size
    itemsize = jnp.dtype(dtype).itemsize
    pack = _SUBLANE_PACK.get(itemsize, 8)

    cost = pl.CostEstimate(flops=0, transcendentals=0,
                           bytes_accessed=2 * n * itemsize)

    if n == 0 or n % 128 != 0:
        # Ragged total size: no lane-dense slab divides n exactly.  Collapse
        # to 2-D (leading dims, last dim) and copy as one full-extent block;
        # Pallas handles the non-aligned tail, no jnp.pad / [:n] slice in HBM.
        # TODO(synk): for large ragged inputs, switch to an N-D BlockSpec over
        # the leading dims instead of a single whole-array block.
        x2d = x.reshape(-1, orig_shape[-1]) if x.ndim != 2 else x
        out = pl.pallas_call(
            _copy_kernel,
            out_shape=jax.ShapeDtypeStruct(x2d.shape, dtype),
            cost_estimate=cost,
        )(x2d)
        return out.reshape(orig_shape)

    lanes = _pick_lanes(n)
    rows = n // lanes
    slab = x.reshape(rows, lanes)        # contiguous reshape: no HBM copy

    # Generation-aware block sizing: bigger blocks on v7x amortize the fixed
    # ~0.35 us/step grid overhead against its ~3.2 TB/s HBM; 2 MiB elsewhere
    # keeps the double-buffered in+out footprint comfortable on v5e.
    target_block_bytes = (4 << 20) if _is_v7x() else (2 << 20)

    if rows <= pack:
        row_tile = rows                  # full-extent block (legal even if < pack)
    else:
        row_target = max(pack, target_block_bytes // (lanes * itemsize))
        row_tile = min(rows, row_target)
        row_tile = max(pack, (row_tile // pack) * pack)   # sublane-dense for bf16/int8
        # Keep >= 2 grid steps when the copy is big enough to matter, so the
        # two TensorCores on v7x split the work and the DMA pipeline engages
        # (neutral on 1-TC chips).
        if row_tile >= rows and rows >= 2 * pack and n * itemsize >= (4 << 20):
            row_tile = max(pack, ((rows + 1) // 2 // pack) * pack)

    grid = pl.cdiv(rows, row_tile)

    out = pl.pallas_call(
        _copy_kernel,
        out_shape=jax.ShapeDtypeStruct((rows, lanes), dtype),
        grid=(grid,),
        in_specs=[pl.BlockSpec((row_tile, lanes), lambda i: (i, 0))],
        out_specs=pl.BlockSpec((row_tile, lanes), lambda i: (i, 0)),
        compiler_params=pltpu.CompilerParams(
            dimension_semantics=("parallel",),   # no reduction; TC-shardable
            vmem_limit_bytes=32 << 20,           # explicit: covers 4 MiB blocks
                                                 # double-buffered in+out on v5e
        ),
        cost_estimate=cost,
    )(slab)
    return out.reshape(orig_shape)


# ----------------------------------------------------------------------------
# ModuleWrapper.forward
# ----------------------------------------------------------------------------
def module_wrapper_forward(x, materialize=False):
    """JAX/Pallas equivalent of ModuleWrapper.forward(x) -> (x, kl).

    ModuleWrapper registers no children and no kl_loss() submodules, so:
      * x passes through unchanged -> zero-copy return (no kernel, no HBM traffic)
      * kl stays 0.0               -> plain constant, no pallas_call launch
    `materialize=True` returns a fresh buffer via XLA's native copy (hits the
    HBM roofline with zero kernel plumbing); pallas_identity_copy is the
    template to start from once children with real per-element work exist.
    """
    # TODO(synk): when children are added to ModuleWrapper, chain their Pallas
    # kernels here (start from pallas_identity_copy's tiling) and emit kl as a
    # second output of the same kernel.
    y = jnp.copy(x) if materialize else x
    kl = jnp.zeros((), jnp.float32)
    return y, kl


if __name__ == "__main__":
    key = jax.random.PRNGKey(0)
    # Small NCHW input consistent with a conv-style module wrapper.
    x = jax.random.normal(key, (2, 4, 16, 16), dtype=jnp.float32)

    # Default (zero-copy, zero-launch) forward path.
    y, kl = module_wrapper_forward(x)
    jax.block_until_ready((y, kl))
    assert y.shape == x.shape and y.dtype == x.dtype
    assert bool(jnp.allclose(y, x))
    assert float(kl) == 0.0

    # Materialized path (XLA native copy, per review).
    y2, kl2 = module_wrapper_forward(x, materialize=True)
    jax.block_until_ready((y2, kl2))
    assert bool(jnp.allclose(y2, x)) and float(kl2) == 0.0

    # Exercise the Pallas template kernel (future-children insertion point):
    # f32, lane-dense slab that divides x.size exactly (no pad / no slice).
    y3 = pallas_identity_copy(x)
    jax.block_until_ready(y3)
    assert y3.shape == x.shape and y3.dtype == x.dtype
    assert bool(jnp.allclose(y3, x))

    # bf16 slab large enough to tile (dtype-aware sublane packing, grid > 1).
    xb = jax.random.normal(key, (2048, 2048), dtype=jnp.float32).astype(jnp.bfloat16)
    yb = pallas_identity_copy(xb)
    jax.block_until_ready(yb)
    assert yb.dtype == jnp.bfloat16 and bool(jnp.array_equal(yb, xb))

    # Ragged total size (no multiple of 128 divides it): single full-extent
    # block, still no wrapper-side pad/slice.
    xr = jax.random.normal(key, (3, 5, 7), dtype=jnp.float32)
    yr = pallas_identity_copy(xr)
    jax.block_until_ready(yr)
    assert bool(jnp.allclose(yr, xr))

    print("KERNEL_OK")
</pallas_src>

<mosaic_0001>
module attributes {stable_mosaic.version = 11 : i64} {
  func.func @_copy_kernel(%arg0: i32, %arg1: memref<1x2048xf32, #tpu.memory_space<vmem>>, %arg2: memref<1x2048xf32, #tpu.memory_space<vmem>>) attributes {dimension_semantics = [#tpu.dimension_semantics<parallel>], iteration_bounds = array<i64: 1>, scalar_prefetch = 0 : i64, scratch_operands = 0 : i64, tpu.core_type = #tpu.core_type<tc>, window_params = [{transform_indices = @transform_0, window_bounds = array<i64: 1, 2048>}, {transform_indices = @transform_1, window_bounds = array<i64: 1, 2048>}]} {
    %c0 = arith.constant 0 : index
    %c0_0 = arith.constant 0 : index
    %0 = vector.load %arg1[%c0, %c0_0] : memref<1x2048xf32, #tpu.memory_space<vmem>>, vector<1x2048xf32>
    %c0_1 = arith.constant 0 : index
    %c0_2 = arith.constant 0 : index
    %1 = vector.load %arg2[%c0_1, %c0_2] : memref<1x2048xf32, #tpu.memory_space<vmem>>, vector<1x2048xf32>
    tpu.vector_store %arg2[%c0_1, %c0_2], %0 {strides = array<i32>} : memref<1x2048xf32, #tpu.memory_space<vmem>>, vector<1x2048xf32>,
    return
  }
  func.func @transform_0(%arg0: i32) -> (i32, i32) {
    %c0_i32 = arith.constant 0 : i32
    %c0_i32_0 = arith.constant 0 : i32
    return %arg0, %c0_i32 : i32, i32
  }
  func.func @transform_1(%arg0: i32) -> (i32, i32) {
    %c0_i32 = arith.constant 0 : i32
    %c0_i32_0 = arith.constant 0 : i32
    return %arg0, %c0_i32 : i32, i32
  }
}

</mosaic_0001>

<bundles_post_ra>
// kernel: tpu_custom_call.1
= control target key start
LH: loop header
LB: loop body
LE: loop exit
PB: predicated region body
PF: predicated region fallthrough
CT: control target
= control target key end

     0   :  { %6 = vsyncpa [#allocation3], 0  ;;  %s126_s0 = inlined_call_operand.hbm [shape: f32[1,2048], index: 0, kind: input, shape index: {}]   ;;  %s127_s1 = inlined_call_operand.hbm [shape: f32[1,2048], index: 1, kind: output, shape index: {}]  }
   0x1   :  { %7 = vsyncpa [#allocation4], 0  ;;  %s90_s6 = smov [#allocation2]   ;;  %s42_s10 = scalar_lea.hbm %s126_s0, 256 }
   0x2   :  { %s14_s7 = sshll.u32 %s90_s6, 4  ;;  %p43_p0 = scmp.ne.s32.totalorder %s126_s0, %s42_s10  ;;  %s15_s7 = int_to_ptr.vmem [resolvable:$true] %s14_s7 }
   0x3   :  { %p46_p1 = scmp.lt.u32.totalorder %s42_s10, %s126_s0 }
   0x5   :  { %p48_p2 = pnand %p46_p1, %p43_p0 }
   0x7   :  { %51 = shalt.err (!%p48_p2)
}
   0x8   :  { %s52_s15 = scalar_lea.vmem %s15_s7, 256  ;;  %p57_p4 = scmp.lt.s32.totalorder %s15_s7, %s15_s7 }
   0x9   :  { %p53_p3 = scmp.ne.s32.totalorder %s15_s7, %s52_s15  ;;  %p58_p5 = scmp.lt.s32.totalorder %s52_s15, %s52_s15 }
   0xb   :  { %p59_p6 = por %p58_p5, %p57_p4 }
   0xd   :  { %p60_p7 = pnand %p59_p6, %p53_p3 }
   0xf   :  { %63 = shalt.err (!%p60_p7)
}
  0x10   :  { %17 = dma.hbm_to_vmem [thread:$0]  %s126_s0, 256, %s15_s7, [#allocation3]  }
  0x11   :  { %86 = dma.done.wait [#allocation3], 256  }
  0x12   :  { %87 = vsyncadd [#allocation3], 4294967040  ;;  %s91_s18 = smov [#allocation5]   ;;  %v21_v0 = vld [vmem:[#allocation2] sm:$0xff]  ;;  %v22_v1 = vld [vmem:[#allocation2 + $0x8] sm:$0xff] }
  0x13   :  { %s31_s19 = sshll.u32 %s91_s18, 4  ;;  %23 = vst [vmem:[#allocation5] sm:$0xff] %v21_v0  ;;  %24 = vst [vmem:[#allocation5 + $0x8] sm:$0xff] %v22_v1  ;;  %s32_s19 = int_to_ptr.vmem [resolvable:$true] %s31_s19 }
  0x14   :  { %s64_s20 = scalar_lea.vmem %s32_s19, 256  ;;  %p69_p9 = scmp.lt.s32.totalorder %s32_s19, %s32_s19 }
  0x15   :  { %p65_p8 = scmp.ne.s32.totalorder %s32_s19, %s64_s20  ;;  %p70_p10 = scmp.lt.s32.totalorder %s64_s20, %s64_s20 }
  0x17   :  { %p71_p11 = por %p70_p10, %p69_p9 }
  0x19   :  { %p72_p12 = pnand %p71_p11, %p65_p8 }
  0x1b   :  { %75 = shalt.err (!%p72_p12)
}
  0x1c   :  { %s76_s0 = scalar_lea.hbm %s127_s1, 256 }
  0x1d   :  { %p77_p13 = scmp.ne.s32.totalorder %s127_s1, %s76_s0  ;;  %p80_p0 = scmp.lt.u32.totalorder %s76_s0, %s127_s1 }
  0x1f   :  { %p82_p1 = pnand %p80_p0, %p77_p13 }
  0x21   :  { %85 = shalt.err (!%p82_p1)
}
  0x22   :  { %34 = dma.vmem_to_hbm [thread:$0]  %s32_s19, 256, %s127_s1, [#allocation4]  }
  0x23   :  { %88 = dma.done.wait [#allocation4], 256  }
  0x24   :  { %89 = vsyncadd [#allocation4], 4294967040 }
  0x25   :  { %38 = vsyncpa [#allocation3], 1 }
  0x26   :  { %39 = vsyncpa [#allocation4], 1 }

</bundles_post_ra>
